<compile_context>
chip_gen: v7x
topology: tpu7x:2x2x1
jax: 0.10.0
libtpu: 0.0.40
codegen_flags: <defaults>
</compile_context>

<pallas_src>
import jax
import jax.numpy as jnp
from jax.experimental import pallas as pl
from jax.experimental.pallas import tpu as pltpu


def _adver_hgnn_kernel(x_ref, a_ref, inv_ref, out_ref):
    # Per grid step (i, j):
    #   x_ref   : (TB, N, D)   node features for i-tile of batches
    #   a_ref   : (TB, N, M)   incidence for i-tile of batches
    #   inv_ref : (TJ, 1)      1 / sum_m A[j, 0, m] for the j-tile of batches
    #   out_ref : (TB, TJ, D)  out[i, j, :] = num[i, :] * inv_denom[j]
    X = x_ref[...].astype(jnp.float32)                      # (TB, N, D)
    A = a_ref[...].astype(jnp.float32)                      # (TB, N, M)

    # ---- HyperEdgeLayer('mean') degree, as a reciprocal (masked_fill(deg==0, 1)) ----
    degree = jnp.sum(A, axis=1)                              # (TB, M)  sum over nodes
    inv_degree = jnp.where(degree == 0.0, 1.0, 1.0 / degree)

    # ---- Fused HyperEdge + NodeAggregate numerator (VPU/XLU only) ----
    w = A[:, 0, :] * inv_degree                              # (TB, M)  centerA / degree
    v = jnp.sum(A * w[:, None, :], axis=2, keepdims=True)    # (TB, N, 1)
    num = jnp.sum(v * X, axis=1)                             # (TB, D)  f32 accumulation

    # ---- PyTorch broadcast quirk: out[i, j, :] = num[i, :] * (1 / sum_m A[j,0,m]) ----
    inv = inv_ref[...].astype(jnp.float32)                   # (TJ, 1)
    out = num[:, None, :] * inv[None, :, :]                  # (TB, TJ, D)
    out_ref[...] = out.astype(out_ref.dtype)


def _pick_batch_tiles(B):
    """Choose (TB, TJ) batch tiles.

    TB tiles the "num" batch axis (leading dim of every block -> not constrained
    by the (8,128) rule); keep >= 2 grid steps along i when B > 1 so v7x's two
    TensorCores both get work.  TJ tiles the denominator batch axis (sublane dim
    of the output block -> must be a multiple of 8 or equal to B).
    """
    tb_cap = 1 if B == 1 else min(8, B // 2)
    TB = 1
    for t in range(1, tb_cap + 1):
        if B % t == 0:
            TB = t
    if B % 8 == 0:
        TJ = 8
        while TJ * 2 <= min(B, 64) and B % (TJ * 2) == 0:
            TJ *= 2
    else:
        # TODO(synk): for large B not divisible by 8, pad the j axis up to a
        # multiple of 8 and slice the output; full-dim TJ is legal and fine for small B.
        TJ = B
    return TB, TJ


def adver_hgnn(X, A, T=None):
    """Forward pass of AdverHGNN('mean'). T is accepted but unused (as in PyTorch)."""
    del T
    B, N, D = X.shape
    _, _, M = A.shape

    TB, TJ = _pick_batch_tiles(B)

    # Per-batch reciprocal of the NodeAggregate denominator as a tiny (B, 1) f32
    # column; each grid step DMAs only TJ scalars of it.
    # (No zero guard here -- PyTorch divides unguarded too.)
    inv_denom = (1.0 / jnp.sum(A[:, 0, :], axis=-1)).astype(jnp.float32)[:, None]  # (B, 1)

    # Per-step double-buffered VMEM footprint:
    #   2*TB*N*(D+M)*4 (X, A) + 2*TB*TJ*D*4 (out) + 2*ceil(TJ/8)*8*128*4 (inv)
    # -- a few hundred KiB at the chosen caps, far under every generation's
    # scoped VMEM default, so no vmem_limit override is needed.
    out = pl.pallas_call(
        _adver_hgnn_kernel,
        out_shape=jax.ShapeDtypeStruct((B, B, D), X.dtype),
        grid_spec=pltpu.PrefetchScalarGridSpec(
            num_scalar_prefetch=0,
            grid=(B // TB, B // TJ),   # j innermost: X/A block index repeats -> DMA skipped
            in_specs=[
                pl.BlockSpec((TB, N, D), lambda i, j: (i, 0, 0)),   # X tile (depends on i only)
                pl.BlockSpec((TB, N, M), lambda i, j: (i, 0, 0)),   # A tile (depends on i only)
                pl.BlockSpec((TJ, 1), lambda i, j: (j, 0)),         # reciprocal denominators
            ],
            out_specs=pl.BlockSpec((TB, TJ, D), lambda i, j: (i, j, 0)),
        ),
        compiler_params=pltpu.CompilerParams(
            dimension_semantics=("parallel", "parallel")),
    )(X, A, inv_denom)

    return out


def adver_hgnn_ref(X, A):
    """Pure-JAX reference mirroring the PyTorch forward exactly."""
    degree = jnp.sum(A, axis=1)[..., None]                     # (B, M, 1)
    degree = jnp.where(degree == 0.0, 1.0, degree)
    Xe = jnp.einsum('bnm,bnd->bmd', A, X) / degree             # (B, M, D)
    centerA = A[:, :1, :]                                      # (B, 1, M)
    num = jnp.einsum('bom,bmd->bod', centerA, Xe)              # (B, 1, D)
    denom = jnp.sum(centerA, axis=2)                           # (B, 1)
    # torch broadcast of (B,1,D) / (B,1)  ->  (B, B, D)
    return num / denom[None, :, :]


if __name__ == "__main__":
    key = jax.random.PRNGKey(0)
    kx, ka, kt = jax.random.split(key, 3)

    B, N, M, D = 2, 8, 8, 128
    X = jax.random.normal(kx, (B, N, D), dtype=jnp.float32)
    A = (jax.random.uniform(ka, (B, N, M)) > 0.5).astype(jnp.float32)
    A = A.at[:, 0, 0].set(1.0)  # keep center-row denominator nonzero so output is finite
    T = jax.random.normal(kt, (B, N), dtype=jnp.float32)  # unused by the forward

    out = jax.block_until_ready(adver_hgnn(X, A, T))
    ref = jax.block_until_ready(adver_hgnn_ref(X, A))

    assert out.shape == (B, B, D), out.shape
    assert jnp.allclose(out, ref, atol=1e-5, rtol=1e-5), "mismatch vs JAX reference"
    print("KERNEL_OK")
</pallas_src>

<mosaic_0001>
module attributes {stable_mosaic.version = 11 : i64} {
  func.func @_adver_hgnn_kernel(%arg0: i32, %arg1: i32, %arg2: memref<1x8x128xf32, #tpu.memory_space<vmem>>, %arg3: memref<1x8x8xf32, #tpu.memory_space<vmem>>, %arg4: memref<2x1xf32, #tpu.memory_space<vmem>>, %arg5: memref<1x2x128xf32, #tpu.memory_space<vmem>>) attributes {dimension_semantics = [#tpu.dimension_semantics<parallel>, #tpu.dimension_semantics<parallel>], iteration_bounds = array<i64: 2, 1>, scalar_prefetch = 0 : i64, scratch_operands = 0 : i64, tpu.core_type = #tpu.core_type<tc>, window_params = [{transform_indices = @transform_0, window_bounds = array<i64: 1, 8, 128>}, {transform_indices = @transform_1, window_bounds = array<i64: 1, 8, 8>}, {transform_indices = @transform_2, window_bounds = array<i64: 2, 1>}, {transform_indices = @transform_3, window_bounds = array<i64: 1, 2, 128>}]} {
    %c0 = arith.constant 0 : index
    %c0_0 = arith.constant 0 : index
    %c0_1 = arith.constant 0 : index
    %0 = vector.load %arg2[%c0, %c0_0, %c0_1] : memref<1x8x128xf32, #tpu.memory_space<vmem>>, vector<1x8x128xf32>
    %c0_2 = arith.constant 0 : index
    %c0_3 = arith.constant 0 : index
    %c0_4 = arith.constant 0 : index
    %1 = vector.load %arg3[%c0_2, %c0_3, %c0_4] : memref<1x8x8xf32, #tpu.memory_space<vmem>>, vector<1x8x8xf32>
    %cst = arith.constant dense<0.000000e+00> : vector<1x8xf32>
    %2 = vector.multi_reduction <add>, %1, %cst [1] : vector<1x8x8xf32> to vector<1x8xf32>
    %cst_5 = arith.constant 0.000000e+00 : f32
    %3 = vector.broadcast %cst_5 : f32 to vector<1x8xf32>
    %4 = arith.cmpf oeq, %2, %3 : vector<1x8xf32>
    %cst_6 = arith.constant 1.000000e+00 : f32
    %5 = vector.broadcast %cst_6 : f32 to vector<1x8xf32>
    %6 = arith.divf %5, %2 : vector<1x8xf32>
    %cst_7 = arith.constant 1.000000e+00 : f32
    %7 = vector.broadcast %cst_7 : f32 to vector<1x8xf32>
    %8 = arith.select %4, %7, %6 : vector<1x8xi1>, vector<1x8xf32>
    %9 = vector.extract_strided_slice %1 {offsets = [0, 0, 0], sizes = [1, 1, 8], strides = [1, 1, 1]} : vector<1x8x8xf32> to vector<1x1x8xf32>
    %10 = vector.shape_cast %9 : vector<1x1x8xf32> to vector<1x8xf32>
    %11 = arith.mulf %10, %8 : vector<1x8xf32>
    %12 = vector.shape_cast %11 : vector<1x8xf32> to vector<1x1x8xf32>
    %13 = vector.broadcast %12 : vector<1x1x8xf32> to vector<1x8x8xf32>
    %14 = arith.mulf %1, %13 : vector<1x8x8xf32>
    %cst_8 = arith.constant dense<0.000000e+00> : vector<1x8xf32>
    %15 = vector.multi_reduction <add>, %14, %cst_8 [2] : vector<1x8x8xf32> to vector<1x8xf32>
    %16 = vector.shape_cast %15 : vector<1x8xf32> to vector<1x8x1xf32>
    %17 = vector.broadcast %16 : vector<1x8x1xf32> to vector<1x8x128xf32>
    %18 = arith.mulf %17, %0 : vector<1x8x128xf32>
    %cst_9 = arith.constant dense<0.000000e+00> : vector<1x128xf32>
    %19 = vector.multi_reduction <add>, %18, %cst_9 [1] : vector<1x8x128xf32> to vector<1x128xf32>
    %c0_10 = arith.constant 0 : index
    %c0_11 = arith.constant 0 : index
    %20 = vector.load %arg4[%c0_10, %c0_11] : memref<2x1xf32, #tpu.memory_space<vmem>>, vector<2x1xf32>
    %21 = vector.shape_cast %19 : vector<1x128xf32> to vector<1x1x128xf32>
    %22 = vector.shape_cast %20 : vector<2x1xf32> to vector<1x2x1xf32>
    %23 = vector.broadcast %21 : vector<1x1x128xf32> to vector<1x2x128xf32>
    %24 = vector.broadcast %22 : vector<1x2x1xf32> to vector<1x2x128xf32>
    %25 = arith.mulf %23, %24 : vector<1x2x128xf32>
    %c0_12 = arith.constant 0 : index
    %c0_13 = arith.constant 0 : index
    %c0_14 = arith.constant 0 : index
    %26 = vector.load %arg5[%c0_12, %c0_13, %c0_14] : memref<1x2x128xf32, #tpu.memory_space<vmem>>, vector<1x2x128xf32>
    tpu.vector_store %arg5[%c0_12, %c0_13, %c0_14], %25 {strides = array<i32>} : memref<1x2x128xf32, #tpu.memory_space<vmem>>, vector<1x2x128xf32>,
    return
  }
  func.func @transform_0(%arg0: i32, %arg1: i32) -> (i32, i32, i32) {
    %c0_i32 = arith.constant 0 : i32
    %c0_i32_0 = arith.constant 0 : i32
    %c0_i32_1 = arith.constant 0 : i32
    return %arg0, %c0_i32, %c0_i32_0 : i32, i32, i32
  }
  func.func @transform_1(%arg0: i32, %arg1: i32) -> (i32, i32, i32) {
    %c0_i32 = arith.constant 0 : i32
    %c0_i32_0 = arith.constant 0 : i32
    %c0_i32_1 = arith.constant 0 : i32
    return %arg0, %c0_i32, %c0_i32_0 : i32, i32, i32
  }
  func.func @transform_2(%arg0: i32, %arg1: i32) -> (i32, i32) {
    %c0_i32 = arith.constant 0 : i32
    %c0_i32_0 = arith.constant 0 : i32
    return %arg1, %c0_i32 : i32, i32
  }
  func.func @transform_3(%arg0: i32, %arg1: i32) -> (i32, i32, i32) {
    %c0_i32 = arith.constant 0 : i32
    %c0_i32_0 = arith.constant 0 : i32
    return %arg0, %arg1, %c0_i32 : i32, i32, i32
  }
}

</mosaic_0001>

<bundles_post_ra>
// kernel: tpu_custom_call.1
= control target key start
LH: loop header
LB: loop body
LE: loop exit
PB: predicated region body
PF: predicated region fallthrough
CT: control target
= control target key end

     0   :  { %8 = vsyncpa [#allocation3], 0  ;;  %s913_s0 = inlined_call_operand.hbm [shape: f32[2,8,128], index: 0, kind: input, shape index: {}]   ;;  %s914_s1 = inlined_call_operand.hbm [shape: f32[2,8,8], index: 1, kind: input, shape index: {}]   ;;  %s915_s2 = inlined_call_operand.vmem [shape: f32[2,1], index: 2, kind: input, shape index: {}]   ;;  %s916_s3 = inlined_call_operand.hbm [shape: f32[2,2,128], index: 3, kind: output, shape index: {}]  }
   0x1   :  { %10 = vsyncpa [#allocation3 + $0x1], 0 }
   0x2   :  { %11 = vsyncpa [#allocation6], 0 }
   0x3   :  { %13 = vsyncpa [#allocation6 + $0x1], 0 }
   0x4   :  { %14 = vsyncpa [#allocation4], 0 }
   0x5   :  { %16 = vsyncpa [#allocation4 + $0x1], 0  ;;  %s684_s12 = smov 0   ;;  %s686_s13 = smov 0  }
   0x6   :  { %s688_s14 = smov 0   ;;  %s690_s15 = smov 0  }
   0x7   :  { %s692_s16 = smov 0   ;;  %s694_s17 = smov 0  }
   0x8 LB: > { %s424_s18 = sadd.s32 4294967295, %s658_s17   ;;  %s425_s19 = sadd.s32 4294967294, %s658_s17   ;;  %s658_s17 = sphi %s694_s17, %s22_s17   ;;  %s654_s16 = sphi %s692_s16, %s936_s16   ;;  %s650_s15 = sphi %s690_s15, %s935_s15   ;;  %s646_s14 = sphi %s688_s14, %s934_s14   ;;  %s642_s13 = sphi %s686_s13, %s933_s13   ;;  %s638_s12 = sphi %s684_s12, %s932_s12  }
   0x9   : > { %s34_s20 = sadd.s32 1, %s654_s16  ;;  %s41_s21 = sadd.s32 1, %s646_s14 }
   0xa   : > { %p36_p0 = scmp.ge.s32.totalorder %s34_s20, 2  ;;  %p48_p1 = scmp.ne.s32.totalorder %s646_s14, %s642_s13 }
   0xb   : > { %p49_p2 = scmp.eq.s32.totalorder %s658_s17, 0  ;;  %p54_p3 = scmp.ne.s32.totalorder %s642_s13, %s638_s12 }
   0xc   : > { %s938_s20 = smov (%p36_p0, %s34_s20), 0  ;;  %p55_p5 = scmp.eq.s32.totalorder %s424_s18, 0 }
   0xd   : > { %p725_p4 = por %p49_p2, %p48_p1  ;;  %s38_s23 = ssub.s32 %s654_s16, %s938_s20 }
   0xe   : > { %p132_p6 = scmp.eq.s32.totalorder %s424_s18, 1  ;;  %p39_p7 = scmp.eq.s32.totalorder %s38_s23, 0 }
   0xf   : > { %p731_p8 = por %p55_p5, %p54_p3  ;;  %p138_p10 = scmp.eq.s32.totalorder %s425_s19, 1 }
  0x10   : > { %p735_p9 = por %p132_p6, %p48_p1  ;;  %p458_p13 = scmp.lt.s32.totalorder %s658_s17, 2 }
  0x11   : > { %s920_s24 = scalar_select %p731_p8, 1, 0 }
  0x12   : > { %s921_s25 = scalar_select %p735_p9, 1, 0 }
  0x13   : > { %s740_s26 = scalar_select %p39_p7, %s646_s14, %s41_s21  }
  0x14   : > { %p742_p11 = por %p138_p10, %p54_p3  ;;  %s749_s28 = sand.u32 1, %s646_s14  }
  0x15   : > { %s429_s29 = sshll.u32 %s749_s28, 3  ;;  %s430_s30 = sshll.u32 %s654_s16, 7 }
  0x16   : > { %s922_s27 = scalar_select %p742_p11, 1, 0 }
  0x17   : > { %s758_s6 = scalar_lea.hbm %s913_s0, %s430_s30  ;;  %s169_s7 = scalar_lea.vmem [#allocation2], %s429_s29 }
  0x18   : > { %s176_s8 = sshll.u32 %s169_s7, 4  ;;  %p766_p0 = pnand %p458_p13, %p725_p4  ;;  %s762_s8 = int_to_ptr.vmem [resolvable:$true] %s176_s8 }
  0x19   : > { %s166_s10 = scalar_lea.sflag [#allocation3], %s749_s28  ;;  %s512_s11 = scalar_lea.hbm %s758_s6, 128 }
  0x1a   : > { %p513_p3 = scmp.ne.s32.totalorder %s758_s6, %s512_s11  ;;  %p514_p5 = pneg %p766_p0 }
  0x1b   : > { %s517_s21 = scalar_lea.hbm %s913_s0, 256  ;;  %p518_p4 = scmp.lt.u32.totalorder %s758_s6, %s913_s0 }
  0x1c   : > { %p515_p6 = pnand %p514_p5, %p513_p3  ;;  %p519_p10 = scmp.lt.u32.totalorder %s517_s21, %s512_s11 }
  0x1d   : > { %p521_p12 = scmp.lt.u32.totalorder %s512_s11, %s758_s6 }
  0x1e   : > { %p516_p7 = pneg %p515_p6  ;;  %p520_p13 = por %p519_p10, %p518_p4 }
  0x20   : > { %p522_p1 = por %p521_p12, %p520_p13 }
  0x22   : > { %p523_p2 = pnand %p522_p1, %p516_p7 }
  0x24   : > { %526 = shalt.err (!%p523_p2)
}
  0x25   : > { %s527_s4 = scalar_lea.vmem %s762_s8, 128  ;;  %s660_s5 = smov [#allocation2]  }
  0x26   : > { %p528_p3 = scmp.ne.s32.totalorder %s762_s8, %s527_s4  ;;  %s532_s7 = sshll.u32 %s660_s5, 4  ;;  %s533_s7 = int_to_ptr.vmem [resolvable:$false] %s532_s7 }
  0x27   : > { %s534_s18 = scalar_lea.vmem %s533_s7, 256  ;;  %p535_p9 = scmp.lt.s32.totalorder %s762_s8, %s533_s7 }
  0x28   : > { %p530_p6 = pnand %p528_p3, %p514_p5  ;;  %p536_p4 = scmp.lt.s32.totalorder %s534_s18, %s527_s4 }
  0x2a   : > { %p531_p11 = pneg %p530_p6  ;;  %p537_p10 = por %p536_p4, %p535_p9 }
  0x2c   : > { %p538_p12 = pnand %p537_p10, %p531_p11 }
  0x2e   : > { %541 = shalt.err (!%p538_p12)
}
  0x2f   : > { %450 = dma.hbm_to_vmem [thread:$0]  (!%p766_p0), %s758_s6, 128, %s762_s8, %s166_s10  }
  0x30   : > { %p924_p1 = scmp.lt.s32.totalorder %s658_s17, 3  ;;  %p925_p2 = scmp.ge.s32.totalorder %s658_s17, 1 }
  0x31   : > { %s811_s22 = scalar_lea.hbm %s914_s1, %s430_s30  ;;  %s187_s23 = scalar_lea.vmem [#allocation5], %s429_s29 }
  0x32   : > { %p802_p7 = pnand %p925_p2, %p924_p1  ;;  %s194_s4 = sshll.u32 %s187_s23, 4  ;;  %s195_s4 = int_to_ptr.vmem [resolvable:$true] %s194_s4 }
  0x33   : > { %s184_s6 = scalar_lea.sflag [#allocation6], %s749_s28  ;;  %s542_s8 = scalar_lea.hbm %s811_s22, 128 }
  0x34   : > { %s926_s11 = scalar_select %p802_p7, 1, 0 }
  0x35   : > { %p543_p9 = scmp.ne.s32.totalorder %s811_s22, %s542_s8  ;;  %s547_s30 = scalar_lea.hbm %s914_s1, 256 }
  0x36   : > { %p548_p3 = scmp.lt.u32.totalorder %s811_s22, %s914_s1  ;;  %p549_p6 = scmp.lt.u32.totalorder %s547_s30, %s542_s8 }
  0x37   : > { %p545_p11 = pnand %p543_p9, %p514_p5  ;;  %p551_p10 = scmp.lt.u32.totalorder %s542_s8, %s811_s22 }
  0x38   : > { %p550_p4 = por %p549_p6, %p548_p3 }
  0x39   : > { %p546_p13 = pneg %p545_p11 }
  0x3a   : > { %p552_p12 = por %p551_p10, %p550_p4 }
  0x3c   : > { %p553_p1 = pnand %p552_p12, %p546_p13 }
  0x3e   : > { %556 = shalt.err (!%p553_p1)
}
  0x3f   : > { %s557_s28 = scalar_lea.vmem %s195_s4, 128  ;;  %s661_s29 = smov [#allocation5]  }
  0x40   : > { %p558_p2 = scmp.ne.s32.totalorder %s195_s4, %s557_s28  ;;  %s562_s19 = sshll.u32 %s661_s29, 4  ;;  %s563_s19 = int_to_ptr.vmem [resolvable:$false] %s562_s19 }
  0x41   : > { %s564_s21 = scalar_lea.vmem %s563_s19, 256  ;;  %p565_p8 = scmp.lt.s32.totalorder %s195_s4, %s563_s19 }
  0x42   : > { %p560_p9 = pnand %p558_p2, %p514_p5  ;;  %p566_p7 = scmp.lt.s32.totalorder %s564_s21, %s557_s28 }
  0x44   : > { %p561_p11 = pneg %p560_p9  ;;  %p567_p3 = por %p566_p7, %p565_p8 }
  0x46   : > { %p568_p6 = pnand %p567_p3, %p561_p11 }
  0x48   : > { %571 = shalt.err (!%p568_p6)
}
  0x49   : > { %453 = dma.hbm_to_vmem [thread:$0]  (!%p766_p0), %s811_s22, 128, %s195_s4, %s184_s6  }
  0x4a   : > { %p927_p13 = scmp.ne.s32.totalorder %s926_s11, 0 }
  0x4b   : > { %s838_s23 = sand.u32 (!%p927_p13), 1, %s642_s13   ;;  %p928_p8 = scmp.ne.s32.totalorder (!%p927_p13), %s920_s24, 0 }
  0x4c   : > { %203 = sbr.rel (%p927_p13) target bundleno = 291 (0x123), region = 32  ;;  %s434_s8 = sshll.u32 (!%p927_p13), %s838_s23, 3 }
  0x4d   : > { %s206_s10 = scalar_lea.sflag (!%p927_p13), [#allocation3], %s838_s23  ;;  %s842_s5 = scalar_lea.vmem (!%p927_p13), [#allocation2], %s434_s8 }
  0x53   : > { %625 = dma.done.wait (%p928_p8), %s206_s10, 128  }
  0x54   : > { %627 = vsyncadd (%p928_p8), %s206_s10, 4294967168  ;;  %s215_s9 = scalar_lea.sflag [#allocation6], %s838_s23  ;;  %s218_s11 = scalar_lea.vmem [#allocation5], %s434_s8 }
  0x55   : > { %629 = dma.done.wait (%p928_p8), %s215_s9, 128  }
  0x56   : > { %631 = vsyncadd (%p928_p8), %s215_s9, 4294967168  ;;  %v662_v0 = vmov 0   ;;  %vm256_vm0 = vcmask 64512   ;;  %v255_v1 = vld [vmem:[%s218_s11] sm:$0xff]  ;;  %v269_v9 = vlaneseq  ;;  %v284_v18 = vld [vmem:[%s915_s2] sm:$0x3] }
  0x57   : > { %509 = vset.pattern.permute.xlu0 %v662_v0  ;;  %v257_v2 = vsel %vm256_vm0, %v255_v1, 0.0  ;;  %v254_v19 = vld [vmem:[%s842_s5] sm:$0xff]  ;;  %s436_s4 = sshll.u32 %s838_s23, 1  ;;  %s438_s6 = sshll.u32 %s650_s15, 5 }
  0x58   : > { %v258_v3 = vrot.slane %v257_v2, 4  ;;  %v270_v10 = vshrl.u32 %v269_v9, 7  ;;  %s249_s30 = scalar_lea.vmem [#allocation7], %s436_s4  ;;  %s864_s29 = scalar_lea.hbm %s916_s3, %s438_s6 }
  0x59   : > { %s307_s7 = sshll.u32 %s249_s30, 4  ;;  %s293_s19 = scalar_lea.sflag [#allocation4], %s838_s23  ;;  %s866_s7 = int_to_ptr.vmem [resolvable:$true] %s307_s7 }
  0x5a   : > { %v259_v4 = vadd.f32 %v258_v3, %v257_v2  ;;  %v271_v12 = vsub.s32 0, %v270_v10  ;;  %s572_s21 = scalar_lea.vmem %s866_s7, 32  ;;  %p929_p5 = scmp.ne.s32.totalorder %s921_s25, 0 }
  0x5b   : > { %p573_p0 = scmp.ne.s32.totalorder %s866_s7, %s572_s21  ;;  %s663_s15 = smov [#allocation7]  }
  0x5c   : > { %v260_v5 = vrot.slane %v259_v4, 2  ;;  %s576_s8 = sshll.u32 %s663_s15, 4  ;;  %s577_s8 = int_to_ptr.vmem [resolvable:$false] %s576_s8 }
  0x5d   : > { %p574_p7 = pnand %p573_p0, %p929_p5  ;;  %s578_s10 = scalar_lea.vmem %s577_s8, 64 }
  0x5e   : > { %v261_v6 = vadd.f32 %v260_v5, %v259_v4  ;;  %p579_p10 = scmp.lt.s32.totalorder %s866_s7, %s577_s8  ;;  %p580_p12 = scmp.lt.s32.totalorder %s578_s10, %s572_s21 }
  0x5f   : > { %p575_p4 = pneg %p574_p7 }
  0x60   : > { %v262_v7 = vrot.slane %v261_v6, 1  ;;  %p581_p1 = por %p580_p12, %p579_p10 }
  0x62   : > { %v263_v8 = vadd.f32 %v262_v7, %v261_v6  ;;  %p582_p2 = pnand %p581_p1, %p575_p4 }
  0x64   : > { %510 = vrcp.f32 %v263_v8  ;;  %vm264_vm1 = vcmp.eq.f32.partialorder %v263_v8, 0.0 }
  0x6e   : > { %v511_v11 = vpop.eup %510 }
  0x6f   : > { %v267_v13 = vsel %vm264_vm1, 1.0, %v511_v11 }
  0x70   : > { %v268_v14 = vmul.f32 %v267_v13, %v255_v1 }
  0x72   : > { %v272_v15 = vrot.slane %v268_v14, %v271_v12 }
  0x74   : > { %v273_v16 = vmul.f32 %v272_v15, %v255_v1 }
  0x76   : > { %v274_v17 = vsel %vm256_vm0, %v273_v16, 0.0 }
  0x77   : > { %275 = vadd.xlane.f32.xlu0 %v274_v17 }
  0x8d   : > { %287 = vperm.xlu0 %509, %v284_v18  }
 0x104   : > { %v276_v20 = vpop.xlane.xlu0 %275 }
 0x105   : > { %v277_v21 = vmul.f32 %v276_v20, %v254_v19 }
 0x107   : > { %v278_v22 = vrot.slane %v277_v21, 4 }
 0x109   : > { %v279_v23 = vadd.f32 %v278_v22, %v277_v21 }
 0x10b   : > { %v280_v24 = vrot.slane %v279_v23, 2 }
 0x10c   : > { %v288_v27 = vpop.permute.xlu0 %287 }
 0x10d   : > { %v281_v25 = vadd.f32 %v280_v24, %v279_v23 }
 0x10f   : > { %v282_v26 = vrot.slane %v281_v25, 1 }
 0x111   : > { %v283_v28 = vadd.f32 %v282_v26, %v281_v25 }
 0x113   : > { %v290_v29 = vmul.f32 %v288_v27, %v283_v28 }
 0x115   : > { %291 = vst [vmem:[%s249_s30] sm:$0x3] %v290_v29 }
 0x116   : > { %585 = shalt.err (!%p582_p2)
}
 0x117   : > { %s586_s23 = scalar_lea.hbm %s864_s29, 32  ;;  %s590_s11 = scalar_lea.hbm %s916_s3, 64 }
 0x118   : > { %p587_p9 = scmp.ne.s32.totalorder %s864_s29, %s586_s23  ;;  %p591_p6 = scmp.lt.u32.totalorder %s864_s29, %s916_s3 }
 0x119   : > { %p592_p13 = scmp.lt.u32.totalorder %s590_s11, %s586_s23  ;;  %p594_p0 = scmp.lt.u32.totalorder %s586_s23, %s864_s29 }
 0x11a   : > { %p588_p11 = pnand %p587_p9, %p929_p5 }
 0x11b   : > { %p593_p8 = por %p592_p13, %p591_p6 }
 0x11c   : > { %p589_p3 = pneg %p588_p11 }
 0x11d   : > { %p595_p7 = por %p594_p0, %p593_p8 }
 0x11f   : > { %p596_p4 = pnand %p595_p7, %p589_p3 }
 0x121   : > { %599 = shalt.err (!%p596_p4)
}
 0x122   : > { %445 = dma.vmem_to_hbm [thread:$0]  (%p929_p5), %s866_s7, 32, %s864_s29, %s293_s19  }
 0x123 PF: > { %s319_s4 = sand.u32 1, %s638_s12   ;;  %p930_p10 = scmp.ne.s32.totalorder %s922_s27, 0 }
 0x124   : > { %p931_p12 = scmp.ge.s32.totalorder %s658_s17, 2  ;;  %s320_s6 = scalar_lea.sflag [#allocation4], %s319_s4 }
 0x126   : > { %p455_p1 = pnand %p931_p12, %p930_p10 }
 0x128   : > { %633 = dma.done.wait (!%p455_p1), %s320_s6, 32  }
 0x129   : > { %635 = vsyncadd (!%p455_p1), %s320_s6, 4294967264  ;;  %s22_s17 = sadd.s32 1, %s658_s17   ;;  %s932_s12 = smov %s642_s13 }
 0x12a   : > { %p19_p2 = scmp.ge.s32.totalorder %s22_s17, 4   ;;  %s933_s13 = smov %s646_s14 }
 0x12b   : > { %s934_s14 = smov %s740_s26  ;;  %s935_s15 = smov %s654_s16 }
 0x12c   : > { %s936_s16 = smov %s938_s20  ;;  %21 = sbr.rel (!%p19_p2) target bundleno = 8 (0x8), region = 93 }
 0x133   :  { %325 = vsyncpa [#allocation3], 1 }
 0x134   :  { %327 = vsyncpa [#allocation3 + $0x1], 1 }
 0x135   :  { %328 = vsyncpa [#allocation6], 1 }
 0x136   :  { %330 = vsyncpa [#allocation6 + $0x1], 1 }
 0x137   :  { %331 = vsyncpa [#allocation4], 1 }
 0x138   :  { %333 = vsyncpa [#allocation4 + $0x1], 1 }

</bundles_post_ra>
